<compile_context>
chip_gen: v7x
topology: tpu7x:2x2x1
jax: 0.10.0
libtpu: 0.0.40
codegen_flags: <defaults>
</compile_context>

<pallas_src>
import math

import jax
import jax.numpy as jnp
from jax.experimental import pallas as pl
from jax.experimental.pallas import tpu as pltpu


def dyt_kernel(a_ref, gamma_ref, beta_ref, x_ref, o_ref):
    # a_ref: SMEM (1,) f32; gamma/beta: VMEM (1, tile_l) in x.dtype;
    # x/o: VMEM (tile_r, tile_l).
    a = a_ref[0].astype(x_ref.dtype)          # keep bf16 compute in bf16
    t = jnp.tanh(a * x_ref[...])              # EUP tanh, elementwise
    o_ref[...] = gamma_ref[...] * t + beta_ref[...]


def _default_block_bytes():
    # Per-generation default: ~6 MiB on v7x (<=64 MiB VMEM, ~3.2 TB/s HBM),
    # ~4 MiB otherwise (v5e/v6e, 128 MiB VMEM). Guarded: fall back to 4 MiB.
    try:
        info = pltpu.get_tpu_info()
        vmem = int(getattr(info, "vmem_capacity_bytes", 128 << 20))
    except Exception:
        vmem = 128 << 20
    return (6 << 20) if vmem <= (64 << 20) else (4 << 20)


def dyt(x, a, gamma, beta, *, target_block_bytes=None):
    """Dynamic Tanh: gamma * tanh(a * x) + beta, broadcasting over last dim.

    x: (..., C); a: (1,); gamma, beta: (C,). Returns array of x's shape/dtype.
    """
    if target_block_bytes is None:
        target_block_bytes = _default_block_bytes()

    orig_shape = x.shape
    C = orig_shape[-1]
    R = int(math.prod(orig_shape[:-1]))
    dtype = x.dtype
    itemsize = jnp.dtype(dtype).itemsize
    # Sublane quantum for the row-tile (f32: 8, bf16: 16, int8/fp8: 32).
    sub = {4: 8, 2: 16, 1: 32}.get(itemsize, 8)

    # Params follow the compute dtype (native bf16 VPU/EUP on v6e/v7x); the
    # scalar `a` stays f32 on the SMEM scalar path and is cast in-kernel.
    gamma = gamma.astype(dtype)
    beta = beta.astype(dtype)
    a = a.astype(jnp.float32).reshape((1,))

    # ---- Lane-dense folding (pad rows instead of masked-store fallback). ----
    k = 1
    pad_rows = 0
    if C % 128 != 0:
        cand = math.lcm(C, 128) // C
        # Only fold if the minimum block (sub rows x folded lane, 4 buffers)
        # would still be VMEM-sane; otherwise keep lane = C.
        if cand * C * itemsize * sub * 4 <= (32 << 20):
            k = cand
            pad_rows = (-R) % k
    lane = k * C
    rows = (R + pad_rows) // k

    x2 = x.reshape(R, C)
    if pad_rows:
        x2 = jnp.concatenate(
            [x2, jnp.zeros((pad_rows, C), dtype=dtype)], axis=0)
    x2 = x2.reshape(rows, lane)
    gamma2 = jnp.tile(gamma, k).reshape(1, lane)
    beta2 = jnp.tile(beta, k).reshape(1, lane)

    # ---- Lane tiling (safety for very wide C; usually one block). ----
    if lane % 128 == 0:
        max_lane = max(128,
                       (target_block_bytes // (sub * itemsize)) // 128 * 128)
        tile_l = min(lane, max_lane)
        if lane % tile_l != 0:
            t = tile_l
            while t >= 128 and lane % t != 0:
                t -= 128
            if t >= 128:
                tile_l = t
    else:
        # TODO(synk): huge non-128-multiple C that refuses folding keeps
        # masked partial stores; acceptable for DyT-sized channel dims.
        tile_l = lane
    n_l = pl.cdiv(lane, tile_l)

    # ---- Row tiling: ~target bytes per block, prefer divisors of rows. ----
    row_bytes = tile_l * itemsize
    tile_r = max(sub, (target_block_bytes // max(row_bytes, 1)) // sub * sub)
    if tile_r >= rows:
        tile_r = rows  # full-extent block is always legal
    else:
        t = tile_r
        best = None
        while t >= sub:
            if rows % t == 0:
                best = t
                break
            t -= sub
        if best is not None and best * 2 >= tile_r:
            tile_r = best  # divisor close to target -> no masked last block
    n_r = pl.cdiv(rows, tile_r)

    # Keep >= 2 grid steps when possible so both v7x TensorCores get work.
    if n_r * n_l == 1 and rows >= 2 * sub:
        tile_r = (((rows + 1) // 2) + sub - 1) // sub * sub
        n_r = pl.cdiv(rows, tile_r)

    # Explicit VMEM budget: x + out, double-buffered (4 x tile), plus the two
    # resident (1, tile_l) param blocks and 1 MiB headroom.
    vmem_need = (4 * tile_r * tile_l * itemsize
                 + 4 * tile_l * itemsize + (1 << 20))
    vmem_limit = int(min(max(vmem_need, 16 << 20), 64 << 20))

    out = pl.pallas_call(
        dyt_kernel,
        out_shape=jax.ShapeDtypeStruct((rows, lane), dtype),
        grid=(n_r, n_l),
        in_specs=[
            # scalar `a` lives in SMEM, same for every grid step
            pl.BlockSpec(memory_space=pltpu.MemorySpace.SMEM),
            pl.BlockSpec((1, tile_l), lambda r, l: (0, l)),        # gamma
            pl.BlockSpec((1, tile_l), lambda r, l: (0, l)),        # beta
            pl.BlockSpec((tile_r, tile_l), lambda r, l: (r, l)),   # x
        ],
        out_specs=pl.BlockSpec((tile_r, tile_l), lambda r, l: (r, l)),
        compiler_params=pltpu.CompilerParams(
            dimension_semantics=("parallel", "parallel"),
            vmem_limit_bytes=vmem_limit),
    )(a, gamma2, beta2, x2)

    out = out.reshape(rows * k, C)
    if pad_rows:
        out = out[:R]
    return out.reshape(orig_shape)


def dyt_reference(x, a, gamma, beta):
    xf = x.astype(jnp.float32)
    return (gamma.astype(jnp.float32) * jnp.tanh(a[0].astype(jnp.float32) * xf)
            + beta.astype(jnp.float32))


if __name__ == "__main__":
    key = jax.random.PRNGKey(0)
    k1, k2, k3, k4, k5 = jax.random.split(key, 5)

    # Case 1: small shape matching DyT(C=32, init_a=0.5) on (B, N, C) tokens.
    B, N, C = 2, 8, 32
    a = jnp.full((1,), 0.5, dtype=jnp.float32)
    gamma = jnp.ones((C,), dtype=jnp.float32)
    beta = jnp.zeros((C,), dtype=jnp.float32)
    x = jax.random.normal(k1, (B, N, C), dtype=jnp.float32)

    out = jax.block_until_ready(dyt(x, a, gamma, beta))
    ref = dyt_reference(x, a, gamma, beta)
    assert out.shape == (B, N, C)
    assert jnp.allclose(out, ref, atol=1e-5, rtol=1e-5)

    # Case 2: non-trivial gamma/beta, non-128-multiple C, tiny block budget to
    # exercise the multi-step 2-D grid + lane-dense fold path.
    B2, N2, C2 = 2, 512, 96
    a2 = jnp.full((1,), 0.7, dtype=jnp.float32)
    gamma2 = jax.random.normal(k2, (C2,), dtype=jnp.float32)
    beta2 = jax.random.normal(k3, (C2,), dtype=jnp.float32)
    x2 = jax.random.normal(k4, (B2, N2, C2), dtype=jnp.float32)

    out2 = jax.block_until_ready(
        dyt(x2, a2, gamma2, beta2, target_block_bytes=64 * 1024))
    ref2 = dyt_reference(x2, a2, gamma2, beta2)
    assert out2.shape == (B2, N2, C2)
    assert jnp.allclose(out2, ref2, atol=1e-5, rtol=1e-5)

    # Case 3: bf16 input with a row count that needs fold-padding
    # (R = 21 rows, k = 8) -> exercises pad + slice and bf16 compute path.
    B3, N3, C3 = 3, 7, 48
    a3 = jnp.full((1,), 0.9, dtype=jnp.float32)
    gamma3 = jnp.linspace(0.5, 1.5, C3, dtype=jnp.float32)
    beta3 = jnp.linspace(-0.2, 0.2, C3, dtype=jnp.float32)
    x3 = jax.random.normal(k5, (B3, N3, C3), dtype=jnp.float32
                           ).astype(jnp.bfloat16)

    out3 = jax.block_until_ready(dyt(x3, a3, gamma3, beta3))
    ref3 = dyt_reference(x3, a3, gamma3, beta3)
    assert out3.shape == (B3, N3, C3)
    assert jnp.allclose(out3.astype(jnp.float32), ref3, atol=2e-2, rtol=2e-2)

    print("KERNEL_OK")
</pallas_src>

<mosaic_0001>
module attributes {stable_mosaic.version = 11 : i64} {
  func.func @dyt_kernel(%arg0: i32, %arg1: i32, %arg2: memref<1xf32, #tpu.memory_space<smem>>, %arg3: memref<1x128xf32, #tpu.memory_space<vmem>>, %arg4: memref<1x128xf32, #tpu.memory_space<vmem>>, %arg5: memref<4x128xf32, #tpu.memory_space<vmem>>, %arg6: memref<4x128xf32, #tpu.memory_space<vmem>>) attributes {dimension_semantics = [#tpu.dimension_semantics<parallel>, #tpu.dimension_semantics<parallel>], iteration_bounds = array<i64: 1, 1>, scalar_prefetch = 0 : i64, scratch_operands = 0 : i64, tpu.core_type = #tpu.core_type<tc>, window_params = [{transform_indices = @transform_0, window_bounds = array<i64: 1>}, {transform_indices = @transform_1, window_bounds = array<i64: 1, 128>}, {transform_indices = @transform_2, window_bounds = array<i64: 1, 128>}, {transform_indices = @transform_3, window_bounds = array<i64: 4, 128>}, {transform_indices = @transform_4, window_bounds = array<i64: 4, 128>}]} {
    %c0 = arith.constant 0 : index
    %0 = memref.load %arg2[%c0] : memref<1xf32, #tpu.memory_space<smem>>
    %c0_0 = arith.constant 0 : index
    %c0_1 = arith.constant 0 : index
    %1 = vector.load %arg5[%c0_0, %c0_1] : memref<4x128xf32, #tpu.memory_space<vmem>>, vector<4x128xf32>
    %2 = vector.broadcast %0 : f32 to vector<4x128xf32>
    %3 = arith.mulf %2, %1 : vector<4x128xf32>
    %4 = math.tanh %3 : vector<4x128xf32>
    %c0_2 = arith.constant 0 : index
    %c0_3 = arith.constant 0 : index
    %5 = vector.load %arg3[%c0_2, %c0_3] : memref<1x128xf32, #tpu.memory_space<vmem>>, vector<1x128xf32>
    %6 = vector.broadcast %5 : vector<1x128xf32> to vector<4x128xf32>
    %7 = arith.mulf %6, %4 : vector<4x128xf32>
    %c0_4 = arith.constant 0 : index
    %c0_5 = arith.constant 0 : index
    %8 = vector.load %arg4[%c0_4, %c0_5] : memref<1x128xf32, #tpu.memory_space<vmem>>, vector<1x128xf32>
    %9 = vector.broadcast %8 : vector<1x128xf32> to vector<4x128xf32>
    %10 = arith.addf %7, %9 : vector<4x128xf32>
    %c0_6 = arith.constant 0 : index
    %c0_7 = arith.constant 0 : index
    %11 = vector.load %arg6[%c0_6, %c0_7] : memref<4x128xf32, #tpu.memory_space<vmem>>, vector<4x128xf32>
    tpu.vector_store %arg6[%c0_6, %c0_7], %10 {strides = array<i32>} : memref<4x128xf32, #tpu.memory_space<vmem>>, vector<4x128xf32>,
    return
  }
  func.func @transform_0(%arg0: i32, %arg1: i32) -> i32 {
    %c0_i32 = arith.constant 0 : i32
    %c0_i32_0 = arith.constant 0 : i32
    return %c0_i32 : i32
  }
  func.func @transform_1(%arg0: i32, %arg1: i32) -> (i32, i32) {
    %c0_i32 = arith.constant 0 : i32
    %c0_i32_0 = arith.constant 0 : i32
    return %c0_i32, %arg1 : i32, i32
  }
  func.func @transform_2(%arg0: i32, %arg1: i32) -> (i32, i32) {
    %c0_i32 = arith.constant 0 : i32
    %c0_i32_0 = arith.constant 0 : i32
    return %c0_i32, %arg1 : i32, i32
  }
  func.func @transform_3(%arg0: i32, %arg1: i32) -> (i32, i32) {
    %c0_i32 = arith.constant 0 : i32
    return %arg0, %arg1 : i32, i32
  }
  func.func @transform_4(%arg0: i32, %arg1: i32) -> (i32, i32) {
    %c0_i32 = arith.constant 0 : i32
    return %arg0, %arg1 : i32, i32
  }
}

</mosaic_0001>

<bundles_post_ra>
// kernel: tpu_custom_call.1
= control target key start
LH: loop header
LB: loop body
LE: loop exit
PB: predicated region body
PF: predicated region fallthrough
CT: control target
= control target key end

     0   :  { %s134_s0 = inlined_call_operand.<no memory space> [shape: f32[1], index: 0, kind: input, shape index: {}]   ;;  %s135_s1 = inlined_call_operand.vmem [shape: f32[1,128], index: 1, kind: input, shape index: {}]   ;;  %s136_s2 = inlined_call_operand.vmem [shape: f32[1,128], index: 2, kind: input, shape index: {}]   ;;  %s137_s3 = inlined_call_operand.vmem [shape: f32[4,128], index: 3, kind: input, shape index: {}]   ;;  %s138_s4 = inlined_call_operand.hbm [shape: f32[4,128], index: 4, kind: output, shape index: {}]  }
   0x1   :  { %v20_v0 = vld [vmem:[%s137_s3] sm:$0xf]  ;;  %v21_v1 = vstv %s134_s0 }
   0x2   :  { %v22_v2 = vmul.f32 %v21_v1, %v20_v0 }
   0x3   :  { %10 = vsyncpa [#allocation4], 0  ;;  %v55_v3 = vld [vmem:[%s135_s1] ss:$0 sm:$0xff]  ;;  %s84_s23 = smov [#allocation3]  }
   0x4   :  { %58 = vtanh.f32 %v22_v2  ;;  %v56_v5 = vld [vmem:[%s136_s2] ss:$0 sm:$0xff]  ;;  %s47_s24 = sshll.u32 %s84_s23, 4  ;;  %s48_s24 = int_to_ptr.vmem [resolvable:$true] %s47_s24 }
   0x5   :  { %s60_s3 = scalar_lea.vmem %s48_s24, 64  ;;  %p65_p1 = scmp.lt.s32.totalorder %s48_s24, %s48_s24 }
   0x6   :  { %p61_p0 = scmp.ne.s32.totalorder %s48_s24, %s60_s3  ;;  %p66_p2 = scmp.lt.s32.totalorder %s60_s3, %s60_s3 }
   0x8   :  { %p67_p3 = por %p66_p2, %p65_p1 }
   0xa   :  { %p68_p4 = pnand %p67_p3, %p61_p0 }
   0xe   :  { %v59_v4 = vpop.eup %58 }
   0xf   :  { %v31_v6 = vmul.f32 %v59_v4, %v55_v3 }
  0x11   :  { %v39_v7 = vadd.f32 %v56_v5, %v31_v6 }
  0x13   :  { %40 = vst [vmem:[#allocation3] sm:$0xf] %v39_v7 }
  0x14   :  { %71 = shalt.err (!%p68_p4)
}
  0x15   :  { %s72_s25 = scalar_lea.hbm %s138_s4, 64 }
  0x16   :  { %p73_p5 = scmp.ne.s32.totalorder %s138_s4, %s72_s25  ;;  %p76_p6 = scmp.lt.u32.totalorder %s72_s25, %s138_s4 }
  0x18   :  { %p78_p7 = pnand %p76_p6, %p73_p5 }
  0x1a   :  { %81 = shalt.err (!%p78_p7)
}
  0x1b   :  { %50 = dma.vmem_to_hbm [thread:$0]  %s48_s24, 64, %s138_s4, [#allocation4]  }
  0x1c   :  { %82 = dma.done.wait [#allocation4], 64  }
  0x1d   :  { %83 = vsyncadd [#allocation4], 4294967232 }
  0x1e   :  { %54 = vsyncpa [#allocation4], 1 }

</bundles_post_ra>
